<compile_context>
chip_gen: v7x
topology: tpu7x:2x2x1
jax: 0.10.0
libtpu: 0.0.40
codegen_flags: <defaults>
</compile_context>

<pallas_src>
import math
from functools import partial

import jax
import jax.numpy as jnp
from jax.experimental import pallas as pl
from jax.experimental.pallas import tpu as pltpu


# ------------------------------------------------------------------ hardware budget

def _vmem_limit_bytes():
    """Generation-aware scoped-VMEM limit: ~half of physical VMEM, clamped."""
    cap = 128 * 1024 * 1024
    try:
        cap = int(getattr(pltpu.get_tpu_info(), "vmem_capacity_bytes", cap))
    except Exception:  # non-TPU tracing / interpret fallback
        pass
    # v5e/v6e (128 MiB) -> 64 MiB limit; v7x (64 MiB) -> 32 MiB limit.
    return max(min(cap // 2, 100 * 1024 * 1024), 16 * 1024 * 1024)


def _largest_tile_rows(n_rows, bytes_of_tile, budget, cap=None):
    """Largest divisor `th` of n_rows with bytes_of_tile(th) <= budget (and th <= cap)."""
    cap = n_rows if cap is None else min(cap, n_rows)
    best = 1
    for th in range(1, n_rows + 1):
        if n_rows % th == 0 and th <= cap and bytes_of_tile(th) <= budget:
            best = th
    return best


# ------------------------------------------------------------------ conv kernel

def _downsample_conv_kernel(x_ref, w_ref, b_ref, o_ref, *, th, wp, c):
    """Stride-2 3x3 conv (padding=1) on a superpixel-packed row tile.

    x_ref: (1, 1, (th+2)*wp, 4c) bf16 -- flat row-major superpixel tile (incl. halo rows)
    w_ref: (4, 4c, c)            bf16 -- per superpixel-offset weights (zero-padded taps)
    b_ref: (1, c)                f32
    o_ref: (1, 1, th*wp, c)      f32  -- column wp-1 of every row is scratch (dropped later)
    """
    n = th * wp
    # Superpixel offsets q: 0 -> (i, j), 1 -> (i, j+1), 2 -> (i+1, j), 3 -> (i+1, j+1).
    # In flat row-major superpixel indexing these are row offsets 0, 1, wp, wp+1, so every
    # operand is one contiguous (n, 4c) window of the block -- one aligned prefix read plus
    # three sublane-shifted reads (XLU), no per-tap reshape/relayout copies, K = 4c per dot.
    acc = jnp.dot(x_ref[0, 0, pl.ds(0, n), :], w_ref[0],
                  preferred_element_type=jnp.float32) + b_ref[...]   # bias folded in
    for q, off in ((1, 1), (2, wp), (3, wp + 1)):
        acc = acc + jnp.dot(x_ref[0, 0, pl.ds(off, n), :], w_ref[q],
                            preferred_element_type=jnp.float32)
    o_ref[0, 0] = acc


def _pack_conv_weights(w):
    """(3,3,Cin,Cout) HWIO -> (4, 4C, C).

    q = 2*dr + dc indexes the superpixel offset (dr, dc); row block 2*hp+wp of Wq holds
    w[2*dr+hp, 2*dc+wp] (zero when that tap falls outside the 3x3 window)."""
    C = w.shape[-1]
    z = jnp.zeros((C, C), w.dtype)
    blocks = []
    for dr in range(2):
        for dc in range(2):
            rows = []
            for hp in range(2):
                for wq in range(2):
                    ki, kj = 2 * dr + hp, 2 * dc + wq
                    rows.append(w[ki, kj] if (ki < 3 and kj < 3) else z)
            blocks.append(jnp.concatenate(rows, axis=0))        # (4C, C)
    return jnp.stack(blocks, axis=0)                            # (4, 4C, C)


def pallas_downsample_conv(x_nhwc, w, b, *, max_tile_rows=None):
    """x: (B, H, W, C) f32; w: (3,3,C,C) HWIO; b: (C,).  stride=2, padding=1."""
    B, H, W, C = x_nhwc.shape
    assert H % 2 == 0 and W % 2 == 0, "TODO(synk): odd spatial sizes not supported"
    Ho, Wo = H // 2, W // 2
    Hp, Wp = Ho + 2, Wo + 1     # superpixel rows (+1 halo, +1 bounds-only) / cols (+1 halo)

    # Single fused prep pass (pad + space-to-depth + bf16 cast): read x once, write the
    # half-sized bf16 superpixel array once.  If upstream layers emit bf16 NHWC (or this
    # packed layout directly), this pass disappears entirely.
    xp = jnp.pad(x_nhwc, ((0, 0), (1, 3), (1, 1), (0, 0)))          # (B, 2Ho+4, 2Wo+2, C)
    xs = xp.reshape(B, Hp, 2, Wp, 2, C).transpose(0, 1, 3, 2, 4, 5)
    xs = xs.reshape(B, Hp, Wp, 4 * C).astype(jnp.bfloat16)          # chan = (2*hp+wp)*C + c

    vmem_limit = _vmem_limit_bytes()

    def tile_bytes(th):
        in_b = (th + 2) * Wp * 4 * C * 2                 # bf16 input block
        out_b = th * Wp * C * 4                          # f32 output block
        tmp = th * Wp * (4 * C * 2 + C * 4)              # live operand window + f32 acc
        return 2 * (in_b + out_b) + tmp + 4 * 4 * C * C * 2   # x2: double-buffered pipeline

    TH = _largest_tile_rows(Ho, tile_bytes, int(0.6 * vmem_limit), cap=max_tile_rows)
    nT = Ho // TH

    if nT == 1:
        x_tiles = xs.reshape(B, 1, Hp * Wp, 4 * C)                   # free, contiguous view
    else:
        # Duplicate the 2 halo rows per tile so BlockSpec tiles stay non-overlapping.
        rows = TH * jnp.arange(nT)[:, None] + jnp.arange(TH + 2)[None, :]
        x_tiles = xs[:, rows].reshape(B, nT, (TH + 2) * Wp, 4 * C)

    w_pk = _pack_conv_weights(w).astype(jnp.bfloat16)    # bf16 MXU operands, f32 accumulate
    b_f32 = b.reshape(1, C).astype(jnp.float32)

    out = pl.pallas_call(
        partial(_downsample_conv_kernel, th=TH, wp=Wp, c=C),
        grid=(B, nT),
        in_specs=[
            pl.BlockSpec((1, 1, (TH + 2) * Wp, 4 * C), lambda bi, ti: (bi, ti, 0, 0)),
            pl.BlockSpec((4, 4 * C, C), lambda bi, ti: (0, 0, 0)),
            pl.BlockSpec((1, C), lambda bi, ti: (0, 0)),
        ],
        out_specs=pl.BlockSpec((1, 1, TH * Wp, C), lambda bi, ti: (bi, ti, 0, 0)),
        out_shape=jax.ShapeDtypeStruct((B, nT, TH * Wp, C), jnp.float32),
        compiler_params=pltpu.CompilerParams(
            dimension_semantics=("parallel", "parallel"),   # megacore: batch AND row tiles
            vmem_limit_bytes=vmem_limit,
        ),
    )(x_tiles, w_pk, b_f32)

    # Drop the scratch column; this slice fuses with the caller's NHWC->NCHW transpose.
    out = out.reshape(B, nT, TH, Wp, C)[:, :, :, :Wo, :]
    return out.reshape(B, Ho, Wo, C)


# ------------------------------------------------------------------ avg-pool kernel

def _avg_pool2_kernel(x_ref, o_ref, *, c):
    """2x2 / stride-2 average pool on a row tile.

    x_ref: (1, 1, th, 2, Wo, 2c) f32 -- pure reshape view of NHWC input (no HBM transpose)
    o_ref: (1, 1, th, Wo, c)     f32
    """
    x = x_ref[0, 0]                                   # (th, 2, Wo, 2c)
    s = x[:, 0] + x[:, 1]                             # H pair        (VPU)
    o_ref[0, 0] = 0.25 * (s[..., :c] + s[..., c:])    # W pair        (lane shift + VPU)


def pallas_avg_pool2(x_nhwc, *, max_tile_rows=None):
    """AvgPool2d(kernel=2, stride=2). x: (B, H, W, C) f32."""
    B, H, W, C = x_nhwc.shape
    assert H % 2 == 0 and W % 2 == 0, "TODO(synk): odd spatial sizes not supported"
    Ho, Wo = H // 2, W // 2
    vmem_limit = _vmem_limit_bytes()

    def tile_bytes(th):
        return 2 * (th * 2 * Wo * 2 * C * 4 + th * Wo * C * 4) + th * 2 * Wo * 2 * C * 4

    TH = _largest_tile_rows(Ho, tile_bytes, int(0.6 * vmem_limit), cap=max_tile_rows)
    nT = Ho // TH
    xv = x_nhwc.reshape(B, nT, TH, 2, Wo, 2 * C)        # free, contiguous view (no transpose)

    out = pl.pallas_call(
        partial(_avg_pool2_kernel, c=C),
        grid=(B, nT),
        in_specs=[pl.BlockSpec((1, 1, TH, 2, Wo, 2 * C),
                               lambda bi, ti: (bi, ti, 0, 0, 0, 0))],
        out_specs=pl.BlockSpec((1, 1, TH, Wo, C), lambda bi, ti: (bi, ti, 0, 0, 0)),
        out_shape=jax.ShapeDtypeStruct((B, nT, TH, Wo, C), jnp.float32),
        compiler_params=pltpu.CompilerParams(
            dimension_semantics=("parallel", "parallel"),
            vmem_limit_bytes=vmem_limit,
        ),
    )(xv)
    return out.reshape(B, Ho, Wo, C)


# ------------------------------------------------------------------ module forward

def downsample_forward(params, x_nchw, down_pool=False, max_tile_rows=None):
    """PyTorch Downsample.forward: NCHW in, NCHW out."""
    x = jnp.transpose(x_nchw, (0, 2, 3, 1))           # NCHW -> NHWC (channels on lanes)
    if down_pool:
        y = pallas_avg_pool2(x, max_tile_rows=max_tile_rows)
    else:
        y = pallas_downsample_conv(x, params["conv_w"], params["conv_b"],
                                   max_tile_rows=max_tile_rows)
    return jnp.transpose(y, (0, 3, 1, 2))              # NHWC -> NCHW


# ------------------------------------------------------------------ main

if __name__ == "__main__":
    B, C, H, W = 2, 16, 16, 16
    key = jax.random.PRNGKey(0)
    kx, kw, kb = jax.random.split(key, 3)

    x_nchw = jax.random.normal(kx, (B, C, H, W), jnp.float32)
    params = {
        "conv_w": jax.random.normal(kw, (3, 3, C, C), jnp.float32) / math.sqrt(9 * C),
        "conv_b": 0.02 * jax.random.normal(kb, (C,), jnp.float32),
    }

    # Reference (f32 XLA conv); kernel uses bf16 MXU operands -> loose tolerance.
    x_nhwc = jnp.transpose(x_nchw, (0, 2, 3, 1))
    ref = jax.lax.conv_general_dilated(
        x_nhwc, params["conv_w"], window_strides=(2, 2), padding=((1, 1), (1, 1)),
        dimension_numbers=("NHWC", "HWIO", "NHWC")) + params["conv_b"]
    ref = jnp.transpose(ref, (0, 3, 1, 2))

    # Default path: stride-2 conv downsample (single Ho tile per image -> no halo gather).
    fwd_conv = jax.jit(lambda xx: downsample_forward(params, xx, down_pool=False))
    out = jax.block_until_ready(fwd_conv(x_nchw))
    assert out.shape == (B, C, H // 2, W // 2), out.shape
    assert bool(jnp.all(jnp.isfinite(out)))
    assert bool(jnp.allclose(out, ref, atol=5e-2, rtol=5e-2)), \
        float(jnp.max(jnp.abs(out - ref)))

    # Same conv, forcing the spatially tiled (halo) path: grid = (B, 2).
    fwd_conv_t = jax.jit(
        lambda xx: downsample_forward(params, xx, down_pool=False, max_tile_rows=4))
    out_t = jax.block_until_ready(fwd_conv_t(x_nchw))
    assert bool(jnp.allclose(out_t, ref, atol=5e-2, rtol=5e-2)), \
        float(jnp.max(jnp.abs(out_t - ref)))

    # Optional path: down_pool=True (AvgPool2d(stride=2)), exact f32.
    fwd_pool = jax.jit(lambda xx: downsample_forward(params, xx, down_pool=True))
    out_p = jax.block_until_ready(fwd_pool(x_nchw))
    ref_p = jnp.transpose(
        x_nhwc.reshape(B, H // 2, 2, W // 2, 2, C).mean(axis=(2, 4)), (0, 3, 1, 2))
    assert out_p.shape == (B, C, H // 2, W // 2), out_p.shape
    assert bool(jnp.allclose(out_p, ref_p, atol=1e-5, rtol=1e-5))

    print("KERNEL_OK")
</pallas_src>

<mosaic_0001>
module attributes {stable_mosaic.version = 11 : i64} {
  func.func @_downsample_conv_kernel(%arg0: i32, %arg1: i32, %arg2: memref<1x1x90x64xbf16, #tpu.memory_space<vmem>>, %arg3: memref<4x64x16xbf16, #tpu.memory_space<vmem>>, %arg4: memref<1x16xf32, #tpu.memory_space<vmem>>, %arg5: memref<1x1x72x16xf32, #tpu.memory_space<vmem>>) attributes {dimension_semantics = [#tpu.dimension_semantics<parallel>, #tpu.dimension_semantics<parallel>], iteration_bounds = array<i64: 2, 1>, scalar_prefetch = 0 : i64, scratch_operands = 0 : i64, tpu.core_type = #tpu.core_type<tc>, window_params = [{transform_indices = @transform_0, window_bounds = array<i64: 1, 1, 90, 64>}, {pipeline_mode = #tpu.pipeline_mode<synchronous>, transform_indices = @transform_1, window_bounds = array<i64: 4, 64, 16>}, {pipeline_mode = #tpu.pipeline_mode<synchronous>, transform_indices = @transform_2, window_bounds = array<i64: 1, 16>}, {transform_indices = @transform_3, window_bounds = array<i64: 1, 1, 72, 16>}]} {
    %c0 = arith.constant 0 : index
    %c0_0 = arith.constant 0 : index
    %c0_1 = arith.constant 0 : index
    %c0_2 = arith.constant 0 : index
    %0 = vector.load %arg2[%c0, %c0_0, %c0_1, %c0_2] : memref<1x1x90x64xbf16, #tpu.memory_space<vmem>>, vector<1x1x72x64xbf16>
    %1 = vector.shape_cast %0 : vector<1x1x72x64xbf16> to vector<72x64xbf16>
    %c0_3 = arith.constant 0 : index
    %c0_4 = arith.constant 0 : index
    %c0_5 = arith.constant 0 : index
    %2 = vector.load %arg3[%c0_3, %c0_4, %c0_5] : memref<4x64x16xbf16, #tpu.memory_space<vmem>>, vector<1x64x16xbf16>
    %3 = vector.shape_cast %2 : vector<1x64x16xbf16> to vector<64x16xbf16>
    %cst = arith.constant dense<0.000000e+00> : vector<72x16xf32>
    %4 = tpu.matmul %1, %3, %cst {dimension_numbers = #tpu.dot_dimension_numbers<[1], [0], [0], [1], [0, 0, 1, 1], [], []>} : vector<72x64xbf16>, vector<64x16xbf16>, vector<72x16xf32> -> vector<72x16xf32>
    %c0_6 = arith.constant 0 : index
    %c0_7 = arith.constant 0 : index
    %5 = vector.load %arg4[%c0_6, %c0_7] : memref<1x16xf32, #tpu.memory_space<vmem>>, vector<1x16xf32>
    %6 = vector.broadcast %5 : vector<1x16xf32> to vector<72x16xf32>
    %7 = arith.addf %4, %6 : vector<72x16xf32>
    %c0_8 = arith.constant 0 : index
    %c0_9 = arith.constant 0 : index
    %c1 = arith.constant 1 : index
    %c0_10 = arith.constant 0 : index
    %8 = vector.load %arg2[%c0_8, %c0_9, %c1, %c0_10] : memref<1x1x90x64xbf16, #tpu.memory_space<vmem>>, vector<1x1x72x64xbf16>
    %9 = vector.shape_cast %8 : vector<1x1x72x64xbf16> to vector<72x64xbf16>
    %c1_11 = arith.constant 1 : index
    %c0_12 = arith.constant 0 : index
    %c0_13 = arith.constant 0 : index
    %10 = vector.load %arg3[%c1_11, %c0_12, %c0_13] : memref<4x64x16xbf16, #tpu.memory_space<vmem>>, vector<1x64x16xbf16>
    %11 = vector.shape_cast %10 : vector<1x64x16xbf16> to vector<64x16xbf16>
    %cst_14 = arith.constant dense<0.000000e+00> : vector<72x16xf32>
    %12 = tpu.matmul %9, %11, %cst_14 {dimension_numbers = #tpu.dot_dimension_numbers<[1], [0], [0], [1], [0, 0, 1, 1], [], []>} : vector<72x64xbf16>, vector<64x16xbf16>, vector<72x16xf32> -> vector<72x16xf32>
    %13 = arith.addf %7, %12 : vector<72x16xf32>
    %c0_15 = arith.constant 0 : index
    %c0_16 = arith.constant 0 : index
    %c9 = arith.constant 9 : index
    %c0_17 = arith.constant 0 : index
    %14 = vector.load %arg2[%c0_15, %c0_16, %c9, %c0_17] : memref<1x1x90x64xbf16, #tpu.memory_space<vmem>>, vector<1x1x72x64xbf16>
    %15 = vector.shape_cast %14 : vector<1x1x72x64xbf16> to vector<72x64xbf16>
    %c2 = arith.constant 2 : index
    %c0_18 = arith.constant 0 : index
    %c0_19 = arith.constant 0 : index
    %16 = vector.load %arg3[%c2, %c0_18, %c0_19] : memref<4x64x16xbf16, #tpu.memory_space<vmem>>, vector<1x64x16xbf16>
    %17 = vector.shape_cast %16 : vector<1x64x16xbf16> to vector<64x16xbf16>
    %cst_20 = arith.constant dense<0.000000e+00> : vector<72x16xf32>
    %18 = tpu.matmul %15, %17, %cst_20 {dimension_numbers = #tpu.dot_dimension_numbers<[1], [0], [0], [1], [0, 0, 1, 1], [], []>} : vector<72x64xbf16>, vector<64x16xbf16>, vector<72x16xf32> -> vector<72x16xf32>
    %19 = arith.addf %13, %18 : vector<72x16xf32>
    %c0_21 = arith.constant 0 : index
    %c0_22 = arith.constant 0 : index
    %c10 = arith.constant 10 : index
    %c0_23 = arith.constant 0 : index
    %20 = vector.load %arg2[%c0_21, %c0_22, %c10, %c0_23] : memref<1x1x90x64xbf16, #tpu.memory_space<vmem>>, vector<1x1x72x64xbf16>
    %21 = vector.shape_cast %20 : vector<1x1x72x64xbf16> to vector<72x64xbf16>
    %c3 = arith.constant 3 : index
    %c0_24 = arith.constant 0 : index
    %c0_25 = arith.constant 0 : index
    %22 = vector.load %arg3[%c3, %c0_24, %c0_25] : memref<4x64x16xbf16, #tpu.memory_space<vmem>>, vector<1x64x16xbf16>
    %23 = vector.shape_cast %22 : vector<1x64x16xbf16> to vector<64x16xbf16>
    %cst_26 = arith.constant dense<0.000000e+00> : vector<72x16xf32>
    %24 = tpu.matmul %21, %23, %cst_26 {dimension_numbers = #tpu.dot_dimension_numbers<[1], [0], [0], [1], [0, 0, 1, 1], [], []>} : vector<72x64xbf16>, vector<64x16xbf16>, vector<72x16xf32> -> vector<72x16xf32>
    %25 = arith.addf %19, %24 : vector<72x16xf32>
    %c0_27 = arith.constant 0 : index
    %c0_28 = arith.constant 0 : index
    %c0_29 = arith.constant 0 : index
    %c0_30 = arith.constant 0 : index
    %26 = vector.load %arg5[%c0_27, %c0_28, %c0_29, %c0_30] : memref<1x1x72x16xf32, #tpu.memory_space<vmem>>, vector<1x1x72x16xf32>
    %27 = vector.shape_cast %26 : vector<1x1x72x16xf32> to vector<72x16xf32>
    %28 = vector.shape_cast %25 : vector<72x16xf32> to vector<1x1x72x16xf32>
    tpu.vector_store %arg5[%c0_27, %c0_28, %c0_29, %c0_30], %28 {strides = array<i32>} : memref<1x1x72x16xf32, #tpu.memory_space<vmem>>, vector<1x1x72x16xf32>,
    return
  }
  func.func @transform_0(%arg0: i32, %arg1: i32) -> (i32, i32, i32, i32) {
    %c0_i32 = arith.constant 0 : i32
    %c0_i32_0 = arith.constant 0 : i32
    %c0_i32_1 = arith.constant 0 : i32
    return %arg0, %arg1, %c0_i32, %c0_i32_0 : i32, i32, i32, i32
  }
  func.func @transform_1(%arg0: i32, %arg1: i32) -> (i32, i32, i32) {
    %c0_i32 = arith.constant 0 : i32
    %c0_i32_0 = arith.constant 0 : i32
    %c0_i32_1 = arith.constant 0 : i32
    %c0_i32_2 = arith.constant 0 : i32
    return %c0_i32, %c0_i32_0, %c0_i32_1 : i32, i32, i32
  }
  func.func @transform_2(%arg0: i32, %arg1: i32) -> (i32, i32) {
    %c0_i32 = arith.constant 0 : i32
    %c0_i32_0 = arith.constant 0 : i32
    %c0_i32_1 = arith.constant 0 : i32
    return %c0_i32, %c0_i32_0 : i32, i32
  }
  func.func @transform_3(%arg0: i32, %arg1: i32) -> (i32, i32, i32, i32) {
    %c0_i32 = arith.constant 0 : i32
    %c0_i32_0 = arith.constant 0 : i32
    %c0_i32_1 = arith.constant 0 : i32
    return %arg0, %arg1, %c0_i32, %c0_i32_0 : i32, i32, i32, i32
  }
}

</mosaic_0001>

<bundles_post_ra>
// kernel: _lambda_.1
= control target key start
LH: loop header
LB: loop body
LE: loop exit
PB: predicated region body
PF: predicated region fallthrough
CT: control target
= control target key end

     0   :  { %8 = vsyncpa [#allocation3], 0  ;;  %s2102_s0 = inlined_call_operand.hbm [shape: bf16[2,1,90,64], index: 0, kind: input, shape index: {}]   ;;  %s2103_s1 = inlined_call_operand.hbm [shape: bf16[4,64,16], index: 1, kind: input, shape index: {}]   ;;  %s2104_s2 = inlined_call_operand.hbm [shape: f32[1,16], index: 2, kind: input, shape index: {}]   ;;  %s2105_s3 = inlined_call_operand.hbm [shape: f32[2,1,72,16], index: 3, kind: output, shape index: {}]  }
   0x1   :  { %10 = vsyncpa [#allocation3 + $0x1], 0 }
   0x2   :  { %11 = vsyncpa [#allocation6], 0 }
   0x3   :  { %12 = vsyncpa [#allocation4], 0 }
   0x4   :  { %14 = vsyncpa [#allocation4 + $0x1], 0  ;;  %s1678_s12 = smov 0   ;;  %s1680_s13 = smov 0  }
   0x5   :  { %s1682_s14 = smov 0   ;;  %s1684_s15 = smov 0  }
   0x6   :  { %s1686_s16 = smov 0   ;;  %s1688_s17 = smov 0  }
   0x7 LB: > { %s1076_s18 = sadd.s32 4294967295, %s1646_s17   ;;  %s1077_s19 = sadd.s32 4294967294, %s1646_s17   ;;  %s1646_s17 = sphi %s1688_s17, %s20_s17   ;;  %s1642_s16 = sphi %s1686_s16, %s2127_s16   ;;  %s1638_s15 = sphi %s1684_s15, %s2126_s15   ;;  %s1634_s14 = sphi %s1682_s14, %s2125_s14   ;;  %s1630_s13 = sphi %s1680_s13, %s2124_s13   ;;  %s1626_s12 = sphi %s1678_s12, %s2123_s12  }
   0x8   : > { %p54_p0 = scmp.ne.s32.totalorder %s1630_s13, %s1626_s12  ;;  %p1712_p1 = scmp.eq.s32.totalorder %s1076_s18, 0 }
   0x9   : > { %p1716_p2 = scmp.eq.s32.totalorder %s1076_s18, 1  ;;  %p128_p3 = scmp.eq.s32.totalorder %s1077_s19, 1 }
   0xa   : > { %s2110_s20 = scalar_select %p1712_p1, 1, 0 }
   0xb   : > { %p1722_p4 = por %p1712_p1, %p54_p0  ;;  %p1078_p5 = scmp.ge.s32.totalorder %s1646_s17, 1 }
   0xc   : > { %p1727_p6 = por %p128_p3, %p54_p0  ;;  %p135_p7 = scmp.lt.s32.totalorder %s1646_s17, 3 }
   0xd   : > { %s2112_s22 = scalar_select %p1722_p4, 1, 0 }
   0xe   : > { %s2113_s23 = scalar_select %p1727_p6, 1, 0 }
   0xf   : > { %p1732_p8 = pnand %p1078_p5, %p135_p7  ;;  %s1648_s25 = smov [#allocation5]  }
  0x10   : > { %s147_s26 = sshll.u32 %s1648_s25, 4  ;;  %s1649_s28 = smov [#allocation7]   ;;  %s1736_s26 = int_to_ptr.vmem [resolvable:$true] %s147_s26 }
  0x11   : > { %p1365_p9 = pneg %p1732_p8  ;;  %s161_s29 = sshll.u32 %s1649_s28, 4  ;;  %s1747_s29 = int_to_ptr.vmem [resolvable:$true] %s161_s29 }
  0x12   : > { %s1474_s5 = scalar_lea.hbm %s2103_s1, 2048 }
  0x13   : > { %p1743_p11 = pnand %p1365_p9, %p1712_p1  ;;  %p1475_p12 = scmp.ne.s32.totalorder %s2103_s1, %s1474_s5 }
  0x14   : > { %p1481_p5 = scmp.lt.u32.totalorder %s1474_s5, %s2103_s1 }
  0x15   : > { %p1476_p13 = pneg %p1743_p11 }
  0x17   : > { %p1477_p0 = pnand %p1476_p13, %p1475_p12 }
  0x19   : > { %p1478_p3 = pneg %p1477_p0 }
  0x1b   : > { %p1483_p7 = pnand %p1481_p5, %p1478_p3 }
  0x1d   : > { %1486 = shalt.err (!%p1483_p7)
}
  0x1e   : > { %s1487_s10 = scalar_lea.vmem %s1736_s26, 2048  ;;  %p1495_p1 = scmp.lt.s32.totalorder %s1736_s26, %s1736_s26 }
  0x1f   : > { %p1488_p9 = scmp.ne.s32.totalorder %s1736_s26, %s1487_s10  ;;  %p1496_p12 = scmp.lt.s32.totalorder %s1487_s10, %s1487_s10 }
  0x21   : > { %p1490_p10 = pnand %p1488_p9, %p1476_p13  ;;  %p1497_p0 = por %p1496_p12, %p1495_p1 }
  0x23   : > { %p1491_p6 = pneg %p1490_p10 }
  0x25   : > { %p1498_p4 = pnand %p1497_p0, %p1491_p6 }
  0x27   : > { %1501 = shalt.err (!%p1498_p4)
}
  0x28   : > { %s1650_s11 = smov 64   ;;  %s1651_s18 = smov 4  }
  0x29   : > { %1368 = dma.hbm_to_vmem [thread:$0]  (!%p1743_p11), %s2103_s1, 2048, %s1736_s26, [#allocation6], %s1650_s11, %s1650_s11, %s1651_s18  }
  0x2a   : > { %s1502_s4 = scalar_lea.hbm %s2104_s2, 16 }
  0x2b   : > { %p1503_p1 = scmp.ne.s32.totalorder %s2104_s2, %s1502_s4  ;;  %p1509_p10 = scmp.lt.u32.totalorder %s1502_s4, %s2104_s2 }
  0x2d   : > { %p1505_p4 = pnand %p1503_p1, %p1476_p13 }
  0x2f   : > { %p1506_p6 = pneg %p1505_p4 }
  0x31   : > { %p1511_p3 = pnand %p1509_p10, %p1506_p6 }
  0x33   : > { %1514 = shalt.err (!%p1511_p3)
}
  0x34   : > { %s1515_s26 = scalar_lea.vmem %s1747_s29, 16  ;;  %s1522_s9 = scalar_lea.vmem %s1747_s29, 32 }
  0x35   : > { %p1516_p5 = scmp.ne.s32.totalorder %s1747_s29, %s1515_s26  ;;  %p1523_p12 = scmp.lt.s32.totalorder %s1747_s29, %s1747_s29 }
  0x36   : > { %p1524_p0 = scmp.lt.s32.totalorder %s1522_s9, %s1515_s26 }
  0x37   : > { %p1518_p7 = pnand %p1516_p5, %p1476_p13 }
  0x38   : > { %p1525_p1 = por %p1524_p0, %p1523_p12 }
  0x39   : > { %p1519_p9 = pneg %p1518_p7 }
  0x3b   : > { %p1526_p4 = pnand %p1525_p1, %p1519_p9 }
  0x3d   : > { %1529 = shalt.err (!%p1526_p4)
}
  0x3e   : > { %1371 = dma.hbm_to_vmem [thread:$0]  (!%p1743_p11), %s2104_s2, 16, %s1747_s29, [#allocation6]  }
  0x3f   : > { %s32_s25 = sadd.s32 1, %s1642_s16  ;;  %s41_s28 = sadd.s32 1, %s1634_s14 }
  0x40   : > { %p34_p13 = scmp.ge.s32.totalorder %s32_s25, 2  ;;  %p48_p6 = scmp.ne.s32.totalorder %s1634_s14, %s1630_s13 }
  0x41   : > { %p49_p10 = scmp.eq.s32.totalorder %s1646_s17, 0  ;;  %p1382_p3 = scmp.lt.s32.totalorder %s1646_s17, 2 }
  0x42   : > { %s2129_s25 = smov (%p34_p13, %s32_s25), 0  ;;  %p1815_p7 = por %p1716_p2, %p48_p6 }
  0x43   : > { %p50_p5 = por %p49_p10, %p48_p6  ;;  %s36_s30 = ssub.s32 %s1642_s16, %s2129_s25 }
  0x44   : > { %s2116_s27 = scalar_select %p1815_p7, 1, 0 }
  0x45   : > { %s172_s4 = sand.u32 1, %s1634_s14   ;;  %p39_p9 = scmp.eq.s32.totalorder %s36_s30, 0 }
  0x46   : > { %s1348_s29 = smul.u32 48, %s172_s4  ;;  %p1822_p11 = pnand %p1382_p3, %p50_p5 }
  0x47   : > { %s1827_s6 = scalar_select %p39_p9, %s1634_s14, %s41_s28  }
  0x48   : > { %s1349_s7 = smul.u32 768, %s1642_s16  ;;  %s176_s8 = scalar_lea.vmem [#allocation2], %s1348_s29 }
  0x49   : > { %s185_s26 = sshll.u32 %s176_s8, 4  ;;  %s1837_s19 = scalar_lea.sflag [#allocation3], %s172_s4  ;;  %s1835_s26 = int_to_ptr.vmem [resolvable:$true] %s185_s26 }
  0x4a   : > { %s1833_s10 = scalar_lea.hbm %s2102_s0, %s1349_s7  ;;  %p1532_p12 = pneg %p1822_p11 }
  0x4b   : > { %s1530_s30 = scalar_lea.hbm %s1833_s10, 768  ;;  %s1535_s7 = scalar_lea.hbm %s2102_s0, 1536 }
  0x4c   : > { %p1531_p2 = scmp.ne.s32.totalorder %s1833_s10, %s1530_s30  ;;  %p1536_p4 = scmp.lt.u32.totalorder %s1833_s10, %s2102_s0 }
  0x4d   : > { %p1537_p13 = scmp.lt.u32.totalorder %s1535_s7, %s1530_s30  ;;  %p1539_p10 = scmp.lt.u32.totalorder %s1530_s30, %s1833_s10 }
  0x4e   : > { %p1533_p0 = pnand %p1532_p12, %p1531_p2 }
  0x4f   : > { %p1538_p6 = por %p1537_p13, %p1536_p4 }
  0x50   : > { %p1534_p1 = pneg %p1533_p0 }
  0x51   : > { %p1540_p3 = por %p1539_p10, %p1538_p6 }
  0x53   : > { %p1541_p5 = pnand %p1540_p3, %p1534_p1 }
  0x55   : > { %1544 = shalt.err (!%p1541_p5)
}
  0x56   : > { %s1545_s4 = scalar_lea.vmem %s1835_s26, 768  ;;  %s1652_s9 = smov [#allocation2]  }
  0x57   : > { %p1546_p9 = scmp.ne.s32.totalorder %s1835_s26, %s1545_s4  ;;  %s1550_s28 = sshll.u32 %s1652_s9, 4  ;;  %s1551_s28 = int_to_ptr.vmem [resolvable:$false] %s1550_s28 }
  0x58   : > { %s1552_s29 = scalar_lea.vmem %s1551_s28, 1536  ;;  %p1553_p7 = scmp.lt.s32.totalorder %s1835_s26, %s1551_s28 }
  0x59   : > { %p1548_p2 = pnand %p1546_p9, %p1532_p12  ;;  %p1554_p4 = scmp.lt.s32.totalorder %s1552_s29, %s1545_s4 }
  0x5b   : > { %p1549_p0 = pneg %p1548_p2  ;;  %p1555_p13 = por %p1554_p4, %p1553_p7 }
  0x5d   : > { %p1556_p6 = pnand %p1555_p13, %p1549_p0 }
  0x5f   : > { %1559 = shalt.err (!%p1556_p6)
}
  0x60   : > { %1375 = dma.hbm_to_vmem [thread:$0]  (!%p1822_p11), %s1833_s10, 768, %s1835_s26, %s1837_s19, %s1650_s11, %s1650_s11, %s1651_s18  }
  0x61   : > { %197 = sbr.rel (%p1732_p8) target bundleno = 429 (0x1ad), region = 32  ;;  %s1871_s30 = sand.u32 (!%p1732_p8), 1, %s1630_s13  }
  0x62   : > { %s1350_s7 = smul.u32 (!%p1732_p8), 48, %s1871_s30  ;;  %s200_s8 = scalar_lea.sflag (!%p1732_p8), [#allocation3], %s1871_s30 }
  0x63   : > { %p2118_p7 = scmp.ne.s32.totalorder (!%p1732_p8), %s2112_s22, 0 }
  0x64   : > { %s1875_s21 = scalar_lea.vmem (!%p1732_p8), [#allocation2], %s1350_s7 }
  0x68   : > { %1613 = dma.done.wait (%p2118_p7), %s200_s8, 768  }
  0x69   : > { %1615 = vsyncadd (%p2118_p7), %s200_s8, 4294966528  ;;  %p2119_p11 = scmp.ne.s32.totalorder %s2110_s20, 0 }
  0x6b   : > { %1617 = dma.done.wait (%p2119_p11), [#allocation6], 2064  }
  0x6c   : > { %1619 = vsyncadd (%p2119_p11), [#allocation6], 4294965232  ;;  %v1653_v0 = vmov 0.0   ;;  %vm1654_vm0 = vmmov 0   ;;  %v1442_v1 = vld [vmem:[#allocation5] sm:$0xff]   ;;  %v1444_v3 = vld [vmem:[#allocation5 + $0x8] sm:$0xff]  }
  0x6d   : > { %1178 = vmatprep.subr.bf16.mxu1 %v1653_v0  ;;  %1234 = vmatprep.subr.bf16.mxu0 %v1653_v0  ;;  %v1443_v2 = vld [vmem:[#allocation5 + $0x40] sm:$0xff]   ;;  %v1445_v4 = vld [vmem:[#allocation5 + $0x48] sm:$0xff]   ;;  %v1446_v5 = vld [vmem:[#allocation5 + $0x10] sm:$0xff]   ;;  %vm438_vm1 = vsmask.f32 7424  ;;  %vm306_vm2 = vcmask 523264  }
  0x6e   : > { %1186 = vmatprep.mubr.msk.bf16.mxu1 %vm1654_vm0, %v1653_v0  ;;  %1242 = vmatprep.mubr.msk.bf16.mxu0 %vm1654_vm0, %v1653_v0  ;;  %v1447_v6 = vld [vmem:[#allocation5 + $0x50] sm:$0xff]   ;;  %v1448_v7 = vld [vmem:[#allocation5 + $0x18] sm:$0xff]   ;;  %v1453_v17 = vld [vmem:[#allocation5 + $0x20] sm:$0xff]   ;;  %vm814_vm3 = vcmask 1046528   ;;  %s1351_s20 = smul.u32 72, %s1871_s30  ;;  %vm944_vm4 = vcmask 130048  }
  0x6f   : > { %1179 = vmatpush3.bf16.msra.mxu1 %v1442_v1  ;;  %1235 = vmatpush3.bf16.msra.mxu0 %v1443_v2  ;;  %v598_v8 = vld [vmem:[%s1875_s21 + $0x4] sm:$0xf]  ;;  %v1897_v9 = vld [vmem:[%s1875_s21 + $0x8] sm:$0xf]  ;;  %v1901_v11 = vld [vmem:[%s1875_s21 + $0xc] sm:$0xff]   ;;  %s1352_s24 = smul.u32 1152, %s1638_s15 }
  0x70   : > { %1180 = vmatprep.subr.bf16.mxu1 %v1653_v0  ;;  %1236 = vmatprep.subr.bf16.mxu0 %v1653_v0  ;;  %v1115_v10 = vcombine.low %v598_v8, %v1897_v9  ;;  %v1449_v12 = vld [vmem:[#allocation5 + $0x58] sm:$0xff]   ;;  %v1450_v13 = vld [vmem:[%s1875_s21] sm:$0xff]   ;;  %v650_v16 = vshll.u32 %v1901_v11, 16  ;;  %v654_v23 = vshrl.u32 %v1901_v11, 16  ;;  %v1457_v26 = vld [vmem:[#allocation5 + $0x28] sm:$0xff]   ;;  %v816_v2 = vrot.slane %v1901_v11, 1 }
  0x71   : > { %v1909_v20 = vld [vmem:[%s1875_s21 + $0x14] sm:$0xff]   ;;  %v1923_v30 = vld [vmem:[%s1875_s21 + $0x1c] sm:$0xff]   ;;  %v1455_v31 = vld [vmem:[%s1875_s21 + $0x8] sm:$0xff]   ;;  %s2019_s22 = scalar_lea.vmem [#allocation8], %s1351_s20  ;;  %s2049_s26 = scalar_lea.hbm %s2105_s3, %s1352_s24 }
  0x72   : > { %v643_v14 = vshrl.u32 %v1115_v10, 16  ;;  %v645_v15 = vshll.u32 %v1115_v10, 16  ;;  %v652_v19 = vrot.slane %v650_v16, 1  ;;  %v1454_v22 = vld [vmem:[#allocation5 + $0x60] sm:$0xff]   ;;  %v658_v24 = vshll.u32 %v1909_v20, 16  ;;  %v1458_v27 = vld [vmem:[#allocation5 + $0x68] sm:$0xff]  }
  0x73   : > { %1181 = vmatpush3.bf16.msra.mxu1 %v1444_v3  ;;  %1237 = vmatpush3.bf16.msra.mxu0 %v1445_v4  ;;  %v1461_v32 = vld [vmem:[#allocation5 + $0x30] sm:$0xff]   ;;  %v662_v33 = vshrl.u32 %v1909_v20, 16  ;;  %v666_v35 = vshll.u32 %v1923_v30, 16  ;;  %v1465_v37 = vld [vmem:[#allocation5 + $0x38] sm:$0xff]   ;;  %v670_v44 = vshrl.u32 %v1923_v30, 16  ;;  %v818_v10 = vrot.slane %v1909_v20, 1 }
  0x74   : > { %1182 = vmatprep.subr.bf16.mxu1 %v1653_v0  ;;  %1238 = vmatprep.subr.bf16.mxu0 %v1653_v0  ;;  %v647_v18 = vrot.slane %v645_v15, 1  ;;  %v656_v28 = vor.u32 %v654_v23, %v652_v19  ;;  %v660_v29 = vrot.slane %v658_v24, 1  ;;  %v1462_v36 = vld [vmem:[#allocation5 + $0x70] sm:$0xff]   ;;  %v1467_v41 = vld [vmem:[#allocation5 + $0x78] sm:$0xff]   ;;  %s970_s11 = sshll.u32 %s2019_s22, 4  ;;  %s955_s15 = scalar_lea.sflag [#allocation4], %s1871_s30  ;;  %s2051_s11 = int_to_ptr.vmem [resolvable:$true] %s970_s11 }
  0x75   : > { %v668_v39 = vrot.slane %v666_v35, 1  ;;  %v1940_v40 = vld [vmem:[%s1875_s21 + $0x24] sm:$0x1f]   ;;  %v1459_v42 = vld [vmem:[%s1875_s21 + $0x10] sm:$0xff]   ;;  %v1463_v48 = vld [vmem:[%s1875_s21 + $0x18] sm:$0xff]   ;;  %s1560_s10 = scalar_lea.vmem %s2051_s11, 1152 }
  0x76   : > { %v648_v21 = vor.u32 %v647_v18, %v643_v14  ;;  %v661_v34 = vsel %vm438_vm1, %v656_v28, %v660_v29  ;;  %v664_v38 = vor.u32 %v662_v33, %v660_v29  ;;  %v674_v45 = vshll.u32 %v1940_v40, 16  ;;  %v1468_v49 = vld [vmem:[%s1875_s21] sm:$0xff]   ;;  %v1469_v51 = vld [vmem:[%s1875_s21 + $0x8] sm:$0xff]   ;;  %v1471_v63 = vld [vmem:[%s1875_s21 + $0x10] sm:$0xff]   ;;  %p1561_p8 = scmp.ne.s32.totalorder %s2051_s11, %s1560_s10  ;;  %p2120_p12 = scmp.ne.s32.totalorder %s2116_s27, 0 }
  0x77   : > { %1183 = vmatpush3.bf16.msra.mxu1 %v1446_v5  ;;  %1239 = vmatpush3.bf16.msra.mxu0 %v1447_v6  ;;  %v672_v46 = vor.u32 %v670_v44, %v668_v39  ;;  %v442_v52 = vshll.u32 %v1468_v49, 16  ;;  %v678_v53 = vshrl.u32 %v1940_v40, 16  ;;  %v1466_v54 = vld [vmem:[%s1875_s21 + $0x20] ss:$0 sps:$4 sm:$0xff]   ;;  %v801_v55 = vld [vmem:[%s1875_s21 + $0x4] sm:$0xe]  ;;  %v819_v14 = vsel %vm814_vm3, %v816_v2, %v818_v10 }
  0x78   : > { %1184 = vmatprep.subr.bf16.mxu1 %v1653_v0  ;;  %1240 = vmatprep.subr.bf16.mxu0 %v1653_v0  ;;  %v653_v25 = vsel %vm438_vm1, %v648_v21, %v652_v19  ;;  %v669_v43 = vsel %vm438_vm1, %v664_v38, %v668_v39  ;;  %v676_v47 = vrot.slane %v674_v45, 1  ;;  %v440_v56 = vshrl.u32 %v1468_v49, 16  ;;  %p1562_p1 = pnand %p1561_p8, %p2120_p12  ;;  %s1655_s19 = smov [#allocation8]  }
  0x79   : > { %v444_v57 = vrot.slane %v442_v52, 1  ;;  %v447_v58 = vshll.u32 %v1469_v51, 16  ;;  %v1129_v60 = vcombine.low %v801_v55, %v1897_v9  ;;  %v451_v4 = vshrl.u32 %v1469_v51, 16  ;;  %v1472_v9 = vld [vmem:[%s1875_s21 + $0x18] sm:$0xff]   ;;  %s1564_s4 = sshll.u32 %s1655_s19, 4  ;;  %s1565_s4 = int_to_ptr.vmem [resolvable:$false] %s1564_s4 }
  0x7a   : > { %v677_v50 = vsel %vm438_vm1, %v672_v46, %v676_v47  ;;  %v680_v59 = vor.u32 %v678_v53, %v676_v47  ;;  %v455_v5 = vshll.u32 %v1471_v63, 16  ;;  %v820_v18 = vrot.slane %v1923_v30, 1  ;;  %v2014_v30 = vld [vmem:[#allocation7] ss:$0 sm:$0xff]  ;;  %p1563_p10 = pneg %p1562_p1  ;;  %s1566_s9 = scalar_lea.vmem %s1565_s4, 2304 }
  0x7b   : > { %1185 = vmatpush3.bf16.msra.mxu1 %v1448_v7  ;;  %1241 = vmatpush3.bf16.msra.mxu0 %v1449_v12  ;;  %v445_v61 = vor.u32 %v444_v57, %v440_v56  ;;  %v449_v62 = vrot.slane %v447_v58, 1  ;;  %v815_v1 = vrot.slane %v1129_v60, 1  ;;  %v459_v12 = vshrl.u32 %v1471_v63, 16  ;;  %p1567_p3 = scmp.lt.s32.totalorder %s2051_s11, %s1565_s4  ;;  %p1568_p5 = scmp.lt.s32.totalorder %s1566_s9, %s1560_s10 }
  0x7c   : > { %1206 = vmatprep.subr.bf16.mxu1 %v1653_v0  ;;  %1262 = vmatprep.subr.bf16.mxu0 %v1653_v0  ;;  %v457_v8 = vrot.slane %v455_v5, 1  ;;  %v467_v20 = vshrl.u32 %v1472_v9, 16 }
  0x7d   : > { %v450_v3 = vsel %vm438_vm1, %v445_v61, %v449_v62  ;;  %v817_v6 = vsel %vm814_vm3, %v815_v1, %v816_v2  ;;  %v453_v7 = vor.u32 %v451_v4, %v449_v62  ;;  %p1569_p9 = por %p1568_p5, %p1567_p3 }
  0x7e   : > { %1187 = vmatmul.mubr.msk.bf16.vlgmr.msra.gmra.mrb[0].mxu1 %vm306_vm2, %v1450_v13  ;;  %1243 = vmatmul.mubr.msk.bf16.vlgmr.msra.gmra.mrb[0].mxu0 %vm306_vm2, %v653_v25  ;;  %v463_v13 = vshll.u32 %v1472_v9, 16  ;;  %v461_v15 = vor.u32 %v459_v12, %v457_v8  ;;  %v822_v25 = vrot.slane %v1940_v40, 1 }
  0x7f   : > { %1207 = vmatpush3.bf16.msra.mxu1 %v1453_v17  ;;  %1190 = vmatprep.mubr.msk.bf16.mxu1 %vm1654_vm0, %v1653_v0  ;;  %v458_v11 = vsel %vm438_vm1, %v453_v7, %v457_v8  ;;  %v1473_v17 = vld [vmem:[%s1875_s21 + $0x20] sm:$0x1f]   ;;  %p1570_p2 = pnand %p1569_p9, %p1563_p10 }
  0x80   : > { %1208 = vmatprep.subr.bf16.mxu1 %v1653_v0  ;;  %1263 = vmatpush3.bf16.msra.mxu0 %v1454_v22  ;;  %v465_v16 = vrot.slane %v463_v13, 1  ;;  %v471_v21 = vshll.u32 %v1473_v17, 16  ;;  %v821_v22 = vsel %vm814_vm3, %v818_v10, %v820_v18  ;;  %v475_v28 = vshrl.u32 %v1473_v17, 16 }
  0x81   : > { %1246 = vmatprep.mubr.msk.bf16.mxu0 %vm1654_vm0, %v1653_v0  ;;  %1264 = vmatprep.subr.bf16.mxu0 %v1653_v0 }
  0x82   : > { %v466_v19 = vsel %vm438_vm1, %v461_v15, %v465_v16  ;;  %v469_v23 = vor.u32 %v467_v20, %v465_v16  ;;  %v473_v24 = vrot.slane %v471_v21, 1 }
  0x83   : > { %1209 = vmatpush3.bf16.msra.mxu1 %v1457_v26 }
  0x84   : > { %1210 = vmatprep.subr.bf16.mxu1 %v1653_v0  ;;  %1265 = vmatpush3.bf16.msra.mxu0 %v1458_v27  ;;  %v474_v26 = vsel %vm438_vm1, %v469_v23, %v473_v24  ;;  %v823_v27 = vsel %vm814_vm3, %v820_v18, %v822_v25  ;;  %v477_v29 = vor.u32 %v475_v28, %v473_v24 }
  0x85   : > { %1266 = vmatprep.subr.bf16.mxu0 %v1653_v0 }
  0x86   : > { %1191 = vmatmul.mubr.msk.bf16.gmra.mrb[4].mxu1 %vm306_vm2, %v1455_v31  ;;  %1247 = vmatmul.mubr.msk.bf16.gmra.mrb[4].mxu0 %vm306_vm2, %v661_v34 }
  0x87   : > { %1194 = vmatprep.mubr.msk.bf16.mxu1 %vm1654_vm0, %v1653_v0  ;;  %1211 = vmatpush3.bf16.msra.mxu1 %v1461_v32 }
  0x88   : > { %1212 = vmatprep.subr.bf16.mxu1 %v1653_v0  ;;  %1250 = vmatprep.mubr.msk.bf16.mxu0 %vm1654_vm0, %v1653_v0 }
  0x89   : > { %1267 = vmatpush3.bf16.msra.mxu0 %v1462_v36 }
  0x8a   : > { %1268 = vmatprep.subr.bf16.mxu0 %v1653_v0 }
  0x8b   : > { %1213 = vmatpush3.bf16.msra.mxu1 %v1465_v37 }
  0x8d   : > { %1269 = vmatpush3.bf16.msra.mxu0 %v1467_v41 }
  0x8e   : > { %1195 = vmatmul.mubr.msk.bf16.gmra.mrb[8].mxu1 %vm306_vm2, %v1459_v42  ;;  %1251 = vmatmul.mubr.msk.bf16.gmra.mrb[8].mxu0 %vm306_vm2, %v669_v43 }
  0x8f   : > { %1198 = vmatprep.mubr.msk.bf16.mxu1 %vm1654_vm0, %v1653_v0  ;;  %1254 = vmatprep.mubr.msk.bf16.mxu0 %vm1654_vm0, %v1653_v0 }
  0x96   : > { %1199 = vmatmul.mubr.msk.bf16.gmra.mrb[12].mxu1 %vm306_vm2, %v1463_v48  ;;  %1255 = vmatmul.mubr.msk.bf16.gmra.mrb[12].mxu0 %vm306_vm2, %v677_v50 }
  0x97   : > { %1202 = vmatprep.mubr.msk.bf16.mxu1 %vm1654_vm0, %v1653_v0  ;;  %1258 = vmatprep.mubr.msk.bf16.mxu0 %vm1654_vm0, %v1653_v0 }
  0x9e   : > { %1203 = vmatmul.mubr.msk.bf16.gmra.mrb[16].mxu1 %vm306_vm2, %v1466_v54  ;;  %1259 = vmatmul.mubr.msk.bf16.gmra.mrb[16].mxu0 %vm306_vm2, %v680_v59 }
  0x9f   : > { %1214 = vmatprep.mubr.msk.bf16.mxu1 %vm1654_vm0, %v1653_v0  ;;  %1270 = vmatprep.mubr.msk.bf16.mxu0 %vm1654_vm0, %v1653_v0 }
  0xa6   : > { %1215 = vmatmul.mubr.msk.bf16.vlgmr.msra.gmra.mrb[0].mxu1 %vm306_vm2, %v450_v3  ;;  %1271 = vmatmul.mubr.msk.bf16.vlgmr.msra.gmra.mrb[0].mxu0 %vm306_vm2, %v817_v6 }
  0xa7   : > { %1218 = vmatprep.mubr.msk.bf16.mxu1 %vm1654_vm0, %v1653_v0  ;;  %1274 = vmatprep.mubr.msk.bf16.mxu0 %vm1654_vm0, %v1653_v0 }
  0xae   : > { %1219 = vmatmul.mubr.msk.bf16.gmra.mrb[4].mxu1 %vm306_vm2, %v458_v11  ;;  %1275 = vmatmul.mubr.msk.bf16.gmra.mrb[4].mxu0 %vm306_vm2, %v819_v14 }
  0xaf   : > { %1222 = vmatprep.mubr.msk.bf16.mxu1 %vm1654_vm0, %v1653_v0  ;;  %1278 = vmatprep.mubr.msk.bf16.mxu0 %vm1654_vm0, %v1653_v0 }
  0xb6   : > { %1223 = vmatmul.mubr.msk.bf16.gmra.mrb[8].mxu1 %vm306_vm2, %v466_v19  ;;  %1279 = vmatmul.mubr.msk.bf16.gmra.mrb[8].mxu0 %vm306_vm2, %v821_v22 }
  0xb7   : > { %1226 = vmatprep.mubr.msk.bf16.mxu1 %vm1654_vm0, %v1653_v0  ;;  %1282 = vmatprep.mubr.msk.bf16.mxu0 %vm1654_vm0, %v1653_v0 }
  0xbe   : > { %1227 = vmatmul.mubr.msk.bf16.gmra.mrb[12].mxu1 %vm306_vm2, %v474_v26  ;;  %1283 = vmatmul.mubr.msk.bf16.gmra.mrb[12].mxu0 %vm306_vm2, %v823_v27 }
  0xbf   : > { %1230 = vmatprep.mubr.msk.bf16.mxu1 %vm1654_vm0, %v1653_v0  ;;  %1286 = vmatprep.mubr.msk.bf16.mxu0 %vm1654_vm0, %v1653_v0 }
  0xc6   : > { %1231 = vmatmul.mubr.msk.bf16.gmra.mrb[16].mxu1 %vm306_vm2, %v477_v29  ;;  %1287 = vmatmul.mubr.msk.bf16.gmra.mrb[16].mxu0 %vm306_vm2, %v822_v25 }
 0x179   : > { %v551_v31 = vpop.f32.mrb[0].mxu1  ;;  %v897_v34 = vpop.f32.mrb[0].mxu0 }
 0x17a   : > { %v1290_v32 = vadd.f32 %v2014_v30, %v551_v31  ;;  %v1216_v33 = vpop.f32.mrb[1].mxu1  ;;  %v1272_v37 = vpop.f32.mrb[1].mxu0 }
 0x17b   : > { %v554_v35 = vpop.f32.mrb[2].mxu1  ;;  %v900_v39 = vpop.f32.mrb[2].mxu0 }
 0x17c   : > { %v1291_v36 = vadd.f32 %v1290_v32, %v897_v34  ;;  %v1292_v38 = vadd.f32 %v2014_v30, %v554_v35  ;;  %v1217_v0 = vpop.f32.mrb[3].mxu1  ;;  %v1273_v41 = vpop.f32.mrb[3].mxu0 }
 0x17e   : > { %945 = vst.msk [vmem:[%s2019_s22] sm:$0xff] %vm944_vm4, %v1291_v36  ;;  %v1293_v40 = vadd.f32 %v1292_v38, %v900_v39 }
 0x180   : > { %946 = vst.msk [vmem:[%s2019_s22 + $0x8] sm:$0xff] %vm944_vm4, %v1293_v40 }
 0x181   : > { %v559_v42 = vpop.f32.mrb[4].mxu1  ;;  %v905_v45 = vpop.f32.mrb[4].mxu0 }
 0x182   : > { %v1294_v43 = vadd.f32 %v2014_v30, %v559_v42  ;;  %v1220_v44 = vpop.f32.mrb[5].mxu1  ;;  %v1276_v48 = vpop.f32.mrb[5].mxu0 }
 0x183   : > { %v562_v46 = vpop.f32.mrb[6].mxu1  ;;  %v908_v51 = vpop.f32.mrb[6].mxu0 }
 0x184   : > { %v1295_v47 = vadd.f32 %v1294_v43, %v905_v45  ;;  %v1296_v49 = vadd.f32 %v2014_v30, %v562_v46  ;;  %v1221_v50 = vpop.f32.mrb[7].mxu1  ;;  %v1277_v53 = vpop.f32.mrb[7].mxu0 }
 0x186   : > { %947 = vst.msk [vmem:[%s2019_s22 + $0x10] sm:$0xff] %vm944_vm4, %v1295_v47  ;;  %v1297_v52 = vadd.f32 %v1296_v49, %v908_v51 }
 0x188   : > { %948 = vst.msk [vmem:[%s2019_s22 + $0x18] sm:$0xff] %vm944_vm4, %v1297_v52 }
 0x189   : > { %v567_v54 = vpop.f32.mrb[8].mxu1  ;;  %v913_v57 = vpop.f32.mrb[8].mxu0 }
 0x18a   : > { %v1298_v55 = vadd.f32 %v2014_v30, %v567_v54  ;;  %v1224_v56 = vpop.f32.mrb[9].mxu1  ;;  %v1280_v60 = vpop.f32.mrb[9].mxu0 }
 0x18b   : > { %v570_v58 = vpop.f32.mrb[10].mxu1  ;;  %v916_v63 = vpop.f32.mrb[10].mxu0 }
 0x18c   : > { %v1299_v59 = vadd.f32 %v1298_v55, %v913_v57  ;;  %v1300_v61 = vadd.f32 %v2014_v30, %v570_v58  ;;  %v1225_v62 = vpop.f32.mrb[11].mxu1  ;;  %v1281_v2 = vpop.f32.mrb[11].mxu0 }
 0x18e   : > { %949 = vst.msk [vmem:[%s2019_s22 + $0x20] sm:$0xff] %vm944_vm4, %v1299_v59  ;;  %v1301_v1 = vadd.f32 %v1300_v61, %v916_v63 }
 0x190   : > { %950 = vst.msk [vmem:[%s2019_s22 + $0x28] sm:$0xff] %vm944_vm4, %v1301_v1 }
 0x191   : > { %v575_v3 = vpop.f32.mrb[12].mxu1  ;;  %v921_v6 = vpop.f32.mrb[12].mxu0 }
 0x192   : > { %v1302_v4 = vadd.f32 %v2014_v30, %v575_v3  ;;  %v1228_v5 = vpop.f32.mrb[13].mxu1  ;;  %v1284_v9 = vpop.f32.mrb[13].mxu0 }
 0x193   : > { %v578_v7 = vpop.f32.mrb[14].mxu1  ;;  %v924_v12 = vpop.f32.mrb[14].mxu0 }
 0x194   : > { %v1303_v8 = vadd.f32 %v1302_v4, %v921_v6  ;;  %v1304_v10 = vadd.f32 %v2014_v30, %v578_v7  ;;  %v1229_v11 = vpop.f32.mrb[15].mxu1  ;;  %v1285_v14 = vpop.f32.mrb[15].mxu0 }
 0x196   : > { %951 = vst.msk [vmem:[%s2019_s22 + $0x30] sm:$0xff] %vm944_vm4, %v1303_v8  ;;  %v1305_v13 = vadd.f32 %v1304_v10, %v924_v12 }
 0x198   : > { %952 = vst.msk [vmem:[%s2019_s22 + $0x38] sm:$0xff] %vm944_vm4, %v1305_v13 }
 0x199   : > { %v583_v15 = vpop.f32.mrb[16].mxu1  ;;  %v929_v18 = vpop.f32.mrb[16].mxu0 }
 0x19a   : > { %v1306_v16 = vadd.f32 %v2014_v30, %v583_v15  ;;  %v1232_v17 = vpop.f32.mrb[17].mxu1  ;;  %v1288_v21 = vpop.f32.mrb[17].mxu0 }
 0x19b   : > { %v586_v19 = vpop.f32.mrb[18].mxu1  ;;  %v932_v23 = vpop.f32.mrb[18].mxu0 }
 0x19c   : > { %v1307_v20 = vadd.f32 %v1306_v16, %v929_v18  ;;  %v1233_v22 = vpop.f32.mrb[19].mxu1  ;;  %v1289_v24 = vpop.f32.mrb[19].mxu0 }
 0x19e   : > { %953 = vst.msk [vmem:[%s2019_s22 + $0x40] sm:$0xff] %vm944_vm4, %v1307_v20 }
 0x19f   : > { %1573 = shalt.err (!%p1570_p2)
}
 0x1a0   : > { %s1574_s28 = scalar_lea.hbm %s2049_s26, 1152  ;;  %s1578_s8 = scalar_lea.hbm %s2105_s3, 2304 }
 0x1a1   : > { %p1575_p0 = scmp.ne.s32.totalorder %s2049_s26, %s1574_s28  ;;  %p1579_p6 = scmp.lt.u32.totalorder %s2049_s26, %s2105_s3 }
 0x1a2   : > { %p1580_p7 = scmp.lt.u32.totalorder %s1578_s8, %s1574_s28  ;;  %p1582_p8 = scmp.lt.u32.totalorder %s1574_s28, %s2049_s26 }
 0x1a3   : > { %p1576_p4 = pnand %p1575_p0, %p2120_p12 }
 0x1a4   : > { %p1581_p11 = por %p1580_p7, %p1579_p6 }
 0x1a5   : > { %p1577_p13 = pneg %p1576_p4 }
 0x1a6   : > { %p1583_p1 = por %p1582_p8, %p1581_p11 }
 0x1a8   : > { %p1584_p10 = pnand %p1583_p1, %p1577_p13 }
 0x1aa   : > { %1587 = shalt.err (!%p1584_p10)
}
 0x1ab   : > { %s1656_s22 = smov 128   ;;  %s1657_s24 = smov 8  }
 0x1ac   : > { %1363 = dma.vmem_to_hbm [thread:$0]  (%p2120_p12), %s2051_s11, 1152, %s2049_s26, %s955_s15, %s1656_s22, %s1656_s22, %s1657_s24  }
 0x1ad PF: > { %s985_s18 = sand.u32 1, %s1626_s12   ;;  %p2121_p3 = scmp.ne.s32.totalorder %s2113_s23, 0 }
 0x1ae   : > { %p2122_p5 = scmp.ge.s32.totalorder %s1646_s17, 2  ;;  %s986_s5 = scalar_lea.sflag [#allocation4], %s985_s18 }
 0x1b0   : > { %p1377_p9 = pnand %p2122_p5, %p2121_p3 }
 0x1b2   : > { %1621 = dma.done.wait (!%p1377_p9), %s986_s5, 1152  }
 0x1b3   : > { %1623 = vsyncadd (!%p1377_p9), %s986_s5, 4294966144  ;;  %s20_s17 = sadd.s32 1, %s1646_s17   ;;  %s2123_s12 = smov %s1630_s13 }
 0x1b4   : > { %p17_p2 = scmp.ge.s32.totalorder %s20_s17, 4   ;;  %s2124_s13 = smov %s1634_s14 }
 0x1b5   : > { %s2125_s14 = smov %s1827_s6  ;;  %s2126_s15 = smov %s1642_s16 }
 0x1b6   : > { %s2127_s16 = smov %s2129_s25  ;;  %19 = sbr.rel (!%p17_p2) target bundleno = 7 (0x7), region = 88 }
 0x1bd   :  { %991 = vsyncpa [#allocation3], 1 }
 0x1be   :  { %993 = vsyncpa [#allocation3 + $0x1], 1 }
 0x1bf   :  { %994 = vsyncpa [#allocation6], 1 }
 0x1c0   :  { %995 = vsyncpa [#allocation4], 1 }
 0x1c1   :  { %997 = vsyncpa [#allocation4 + $0x1], 1 }

</bundles_post_ra>
